<compile_context>
chip_gen: v6e
topology: v6e:2x2x1
jax: 0.10.0
libtpu: 0.0.40
codegen_flags: <defaults>
</compile_context>

<pallas_src>
import functools

import jax
import jax.numpy as jnp
from jax import lax
from jax.experimental import pallas as pl
from jax.experimental.pallas import tpu as pltpu

LANE = 128
NCORES = 2                             # leading "parallel" axis (v7x: 2 TCs/chip)
TARGET_BLOCK_BYTES = 2 * 1024 * 1024   # ~2 MiB per input block (HBM streaming)
ACC_ROWS_MAX = 256                     # fixed accumulator: 256x128 f32 = 128 KiB


def _round_up(x, m):
    return ((x + m - 1) // m) * m


def _focal_loss_kernel(x_ref, t_ref, out_ref, acc_ref, *, alpha, gamma,
                       n_rows, bm, per_core, acc_rows, need_mask):
    c = pl.program_id(0)               # core-parallel axis
    j = pl.program_id(1)               # row-block reduction axis
    nj = pl.num_programs(1)

    @pl.when(j == 0)
    def _():
        acc_ref[...] = jnp.zeros_like(acc_ref)

    x = x_ref[...].astype(jnp.float32)
    t = t_ref[...].astype(jnp.float32)

    # Shared transcendental: e = exp(-|x|) feeds both the sigmoid and the
    # numerically-stable BCE-with-logits term.
    e = jnp.exp(-jnp.abs(x))
    d = 1.0 + e
    r = pl.reciprocal(d, approx=True)          # EUP vrcp (separate slot)
    r = r * (2.0 - d * r)                      # one Newton step: ~f32-exact, 2 VPU ops
    p = jnp.where(x >= 0, r, 1.0 - r)          # sigmoid(x)

    # binary_cross_entropy_with_logits, reduction='none', stable form:
    # max(x, 0) - x*t + log1p(exp(-|x|))
    ce = jnp.maximum(x, 0.0) - x * t + jnp.log1p(e)

    p_t = p * t + (1.0 - p) * (1.0 - t)
    one_minus_pt = 1.0 - p_t

    g = float(gamma)
    if g == int(g) and 0 <= int(g) <= 4:
        mod = jnp.ones_like(one_minus_pt)      # small integer gamma: plain muls
        for _ in range(int(g)):
            mod = mod * one_minus_pt
    else:
        # Fallback: true pow (EUP exp/log); clamp guards log(<0).
        mod = jnp.maximum(one_minus_pt, 0.0) ** g

    loss = ce * mod
    if alpha >= 0:
        alpha_t = alpha * t + (1.0 - alpha) * (1.0 - t)
        loss = alpha_t * loss

    def fold(v):
        # Fold the (bm, LANE) block into the fixed (acc_rows, LANE) accumulator
        # with a short chain of VPU adds (one add per loaded vreg).
        out = v[0:acc_rows, :]
        for s in range(1, bm // acc_rows):
            out = out + v[s * acc_rows:(s + 1) * acc_rows, :]
        return out

    if need_mask:
        row0 = (c * per_core + j) * bm         # un-clamped global row offset
        # Only blocks overhanging the valid row range (the real last block and
        # any duplicate block created by the 2-core split) need the row mask.
        @pl.when(row0 + bm > n_rows)
        def _():
            ridx = row0 + lax.broadcasted_iota(jnp.int32, loss.shape, 0)
            # Select (not multiply): NaN/garbage from OOB rows is discarded.
            acc_ref[...] += fold(jnp.where(ridx < n_rows, loss, 0.0))

        @pl.when(row0 + bm <= n_rows)
        def _():
            acc_ref[...] += fold(loss)
    else:
        acc_ref[...] += fold(loss)

    @pl.when(j == nj - 1)
    def _():
        # One cross-lane reduce per core; partial sums are combined (and the
        # mean division applied) in the wrapper.
        out_ref[...] = jnp.sum(acc_ref[...], keepdims=True)


def _elementwise_focal_loss(x, t, alpha, gamma):
    """Plain-jnp elementwise focal loss (reference & <128-element lane tail)."""
    x = x.astype(jnp.float32)
    t = t.astype(jnp.float32)
    p = jax.nn.sigmoid(x)
    ce = jnp.maximum(x, 0.0) - x * t + jnp.log1p(jnp.exp(-jnp.abs(x)))
    p_t = p * t + (1.0 - p) * (1.0 - t)
    loss = ce * (1.0 - p_t) ** gamma
    if alpha >= 0:
        loss = (alpha * t + (1.0 - alpha) * (1.0 - t)) * loss
    return loss


def sigmoid_focal_loss(inputs, targets, *, alpha=0.25, gamma=2.0,
                       reduction="mean", input_type="activation"):
    """Pallas implementation of SigmoidFocalLoss.forward ('mean'/'sum')."""
    assert inputs.shape == targets.shape
    if reduction not in ("mean", "sum"):
        # TODO(synk): reduction='none' (full-shape elementwise output) is not
        # wired into the scalar-accumulator kernel.
        raise NotImplementedError(reduction)
    # input_type only selects p = sigmoid(inputs); the reference always uses
    # logits for the CE term, which is what the kernel does.
    del input_type

    n_total = int(inputs.size)
    x_flat = jnp.ravel(inputs)
    t_flat = jnp.ravel(targets)
    rem = n_total % LANE
    n_main = n_total - rem              # 128-aligned prefix handled in-kernel

    total = jnp.float32(0.0)
    if n_main:
        rows = n_main // LANE
        # Zero-offset contiguous prefix view: no jnp.pad copy of the inputs.
        x2 = (x_flat[:n_main] if rem else x_flat).reshape(rows, LANE)
        t2 = (t_flat[:n_main] if rem else t_flat).reshape(rows, LANE)

        itemsizes = (jnp.dtype(inputs.dtype).itemsize,
                     jnp.dtype(targets.dtype).itemsize)
        # Row tile: ~TARGET_BLOCK_BYTES for the widest input dtype so each
        # grid step moves enough data to amortize per-step pipeline overhead.
        bm_target = max(256,
                        (TARGET_BLOCK_BYTES // (LANE * max(itemsizes))) // 256 * 256)
        if rows >= bm_target:
            bm = bm_target
        else:
            sub = 8 * max(1, 4 // min(itemsizes))   # sublane pack for dtype
            bm = _round_up(rows, sub)
        acc_rows = (ACC_ROWS_MAX
                    if (bm >= ACC_ROWS_MAX and bm % ACC_ROWS_MAX == 0) else bm)

        blocks = pl.cdiv(rows, bm)
        per_core = pl.cdiv(blocks, NCORES)
        need_mask = (NCORES * per_core * bm) != rows

        def in_map(c, j):
            # Clamp so duplicate blocks from the 2-core split never index past
            # the array; their contribution is masked out in-kernel.
            return (jnp.minimum(c * per_core + j, blocks - 1), 0)

        kernel = functools.partial(
            _focal_loss_kernel,
            alpha=float(alpha), gamma=float(gamma),
            n_rows=rows, bm=bm, per_core=per_core, acc_rows=acc_rows,
            need_mask=need_mask)

        # VMEM: 2 inputs x 2 buffers x <=2 MiB + <=128 KiB acc  (< 16 MiB v5e
        # default scoped limit -> no vmem_limit_bytes override needed).
        # TODO(synk): try pipeline_mode=pl.Buffered(3) on the inputs if a
        # profile shows exposed DMA between grid steps.
        partials = pl.pallas_call(
            kernel,
            out_shape=jax.ShapeDtypeStruct((NCORES, 1, 1), jnp.float32),
            grid_spec=pltpu.PrefetchScalarGridSpec(
                num_scalar_prefetch=0,
                grid=(NCORES, per_core),
                in_specs=[
                    pl.BlockSpec((bm, LANE), in_map),
                    pl.BlockSpec((bm, LANE), in_map),
                ],
                out_specs=pl.BlockSpec((None, 1, 1), lambda c, j: (c, 0, 0)),
                scratch_shapes=[pltpu.VMEM((acc_rows, LANE), jnp.float32)],
            ),
            compiler_params=pltpu.CompilerParams(
                dimension_semantics=("parallel", "arbitrary")),
        )(x2, t2)
        total = jnp.sum(partials)

    if rem:
        # <=127-element lane tail in plain jnp (avoids copying/padding the full
        # inputs just to make the element count a multiple of 128).
        total = total + jnp.sum(_elementwise_focal_loss(
            x_flat[n_main:], t_flat[n_main:], float(alpha), float(gamma)))

    if reduction == "mean":
        total = total / jnp.float32(n_total)
    return total


def _reference_focal_loss(inputs, targets, alpha=0.25, gamma=2.0, reduction="mean"):
    loss = _elementwise_focal_loss(inputs, targets, alpha, gamma)
    return jnp.mean(loss) if reduction == "mean" else jnp.sum(loss)


if __name__ == "__main__":
    key = jax.random.PRNGKey(0)
    k1, k2 = jax.random.split(key)
    # NCHW "convolution map without activation" (logits) and binary targets.
    x = jax.random.normal(k1, (2, 4, 16, 16), dtype=jnp.float32) * 2.0
    t = jax.random.bernoulli(k2, p=0.3, shape=(2, 4, 16, 16)).astype(jnp.float32)

    loss = sigmoid_focal_loss(x, t, alpha=0.25, gamma=2.0, reduction="mean")
    loss = jax.block_until_ready(loss)
    ref = _reference_focal_loss(x, t, 0.25, 2.0, "mean")
    assert jnp.allclose(loss, ref, rtol=1e-4, atol=1e-6), (loss, ref)

    # Also exercise the non-multiple-of-128 tail path and 'sum' reduction.
    k3, k4 = jax.random.split(k2)
    x2 = jax.random.normal(k3, (2, 3, 7, 5), dtype=jnp.float32)
    t2 = jax.random.bernoulli(k4, p=0.5, shape=(2, 3, 7, 5)).astype(jnp.float32)
    loss2 = jax.block_until_ready(
        sigmoid_focal_loss(x2, t2, alpha=0.25, gamma=2.0, reduction="sum"))
    ref2 = _reference_focal_loss(x2, t2, 0.25, 2.0, "sum")
    assert jnp.allclose(loss2, ref2, rtol=1e-4, atol=1e-5), (loss2, ref2)

    print("KERNEL_OK")
</pallas_src>

<mosaic_0001>
module attributes {stable_mosaic.version = 11 : i64} {
  func.func @_focal_loss_kernel(%arg0: i32, %arg1: i32, %arg2: memref<16x128xf32, #tpu.memory_space<vmem>>, %arg3: memref<16x128xf32, #tpu.memory_space<vmem>>, %arg4: memref<1x1x1xf32, #tpu.memory_space<vmem>>, %arg5: memref<16x128xf32, #tpu.memory_space<vmem>>) attributes {dimension_semantics = [#tpu.dimension_semantics<parallel>, #tpu.dimension_semantics<arbitrary>], iteration_bounds = array<i64: 2, 1>, scalar_prefetch = 0 : i64, scratch_operands = 1 : i64, tpu.core_type = #tpu.core_type<tc>, window_params = [{transform_indices = @transform_0, window_bounds = array<i64: 16, 128>}, {transform_indices = @transform_1, window_bounds = array<i64: 16, 128>}, {transform_indices = @transform_2, window_bounds = array<i64: 1, 1, 1>}]} {
    %c0_i32 = arith.constant 0 : i32
    %0 = arith.cmpi eq, %arg1, %c0_i32 : i32
    %1 = arith.extui %0 : i1 to i32
    %c0_i32_0 = arith.constant 0 : i32
    %2 = arith.cmpi ne, %1, %c0_i32_0 : i32
    scf.if %2 {
      %cst_24 = arith.constant 0.000000e+00 : f32
      %62 = vector.broadcast %cst_24 : f32 to vector<16x128xf32>
      %c0_25 = arith.constant 0 : index
      %c0_26 = arith.constant 0 : index
      %63 = vector.load %arg5[%c0_25, %c0_26] : memref<16x128xf32, #tpu.memory_space<vmem>>, vector<16x128xf32>
      tpu.vector_store %arg5[%c0_25, %c0_26], %62 {strides = array<i32>} : memref<16x128xf32, #tpu.memory_space<vmem>>, vector<16x128xf32>,
    } else {
    }
    %c0 = arith.constant 0 : index
    %c0_1 = arith.constant 0 : index
    %3 = vector.load %arg2[%c0, %c0_1] : memref<16x128xf32, #tpu.memory_space<vmem>>, vector<16x128xf32>
    %c0_2 = arith.constant 0 : index
    %c0_3 = arith.constant 0 : index
    %4 = vector.load %arg3[%c0_2, %c0_3] : memref<16x128xf32, #tpu.memory_space<vmem>>, vector<16x128xf32>
    %5 = math.absf %3 : vector<16x128xf32>
    %cst = arith.constant 0.000000e+00 : f32
    %6 = vector.broadcast %cst : f32 to vector<16x128xf32>
    %7 = arith.subf %6, %5 : vector<16x128xf32>
    %8 = math.exp %7 : vector<16x128xf32>
    %cst_4 = arith.constant 1.000000e+00 : f32
    %9 = vector.broadcast %cst_4 : f32 to vector<16x128xf32>
    %10 = arith.addf %9, %8 : vector<16x128xf32>
    %11 = tpu.reciprocal %10 {approx = true} : vector<16x128xf32> -> vector<16x128xf32>
    %12 = arith.mulf %10, %11 : vector<16x128xf32>
    %cst_5 = arith.constant 2.000000e+00 : f32
    %13 = vector.broadcast %cst_5 : f32 to vector<16x128xf32>
    %14 = arith.subf %13, %12 : vector<16x128xf32>
    %15 = arith.mulf %11, %14 : vector<16x128xf32>
    %cst_6 = arith.constant 0.000000e+00 : f32
    %16 = vector.broadcast %cst_6 : f32 to vector<16x128xf32>
    %17 = arith.cmpf oge, %3, %16 : vector<16x128xf32>
    %cst_7 = arith.constant 1.000000e+00 : f32
    %18 = vector.broadcast %cst_7 : f32 to vector<16x128xf32>
    %19 = arith.subf %18, %15 : vector<16x128xf32>
    %20 = arith.select %17, %15, %19 : vector<16x128xi1>, vector<16x128xf32>
    %cst_8 = arith.constant 0.000000e+00 : f32
    %21 = vector.broadcast %cst_8 : f32 to vector<16x128xf32>
    %22 = arith.maximumf %3, %21 : vector<16x128xf32>
    %23 = arith.mulf %3, %4 : vector<16x128xf32>
    %24 = arith.subf %22, %23 : vector<16x128xf32>
    %25 = math.log1p %8 : vector<16x128xf32>
    %26 = arith.addf %24, %25 : vector<16x128xf32>
    %27 = arith.mulf %20, %4 : vector<16x128xf32>
    %cst_9 = arith.constant 1.000000e+00 : f32
    %28 = vector.broadcast %cst_9 : f32 to vector<16x128xf32>
    %29 = arith.subf %28, %20 : vector<16x128xf32>
    %cst_10 = arith.constant 1.000000e+00 : f32
    %30 = vector.broadcast %cst_10 : f32 to vector<16x128xf32>
    %31 = arith.subf %30, %4 : vector<16x128xf32>
    %32 = arith.mulf %29, %31 : vector<16x128xf32>
    %33 = arith.addf %27, %32 : vector<16x128xf32>
    %cst_11 = arith.constant 1.000000e+00 : f32
    %34 = vector.broadcast %cst_11 : f32 to vector<16x128xf32>
    %35 = arith.subf %34, %33 : vector<16x128xf32>
    %cst_12 = arith.constant 1.000000e+00 : f32
    %36 = vector.broadcast %cst_12 : f32 to vector<16x128xf32>
    %37 = arith.mulf %36, %35 : vector<16x128xf32>
    %38 = arith.mulf %37, %35 : vector<16x128xf32>
    %39 = arith.mulf %26, %38 : vector<16x128xf32>
    %cst_13 = arith.constant 2.500000e-01 : f32
    %40 = vector.broadcast %cst_13 : f32 to vector<16x128xf32>
    %41 = arith.mulf %40, %4 : vector<16x128xf32>
    %cst_14 = arith.constant 1.000000e+00 : f32
    %42 = vector.broadcast %cst_14 : f32 to vector<16x128xf32>
    %43 = arith.subf %42, %4 : vector<16x128xf32>
    %cst_15 = arith.constant 7.500000e-01 : f32
    %44 = vector.broadcast %cst_15 : f32 to vector<16x128xf32>
    %45 = arith.mulf %44, %43 : vector<16x128xf32>
    %46 = arith.addf %41, %45 : vector<16x128xf32>
    %47 = arith.mulf %46, %39 : vector<16x128xf32>
    %c1_i32 = arith.constant 1 : i32
    %48 = arith.muli %arg0, %c1_i32 : i32
    %49 = arith.addi %48, %arg1 : i32
    %c16_i32 = arith.constant 16 : i32
    %50 = arith.muli %49, %c16_i32 : i32
    %c16_i32_16 = arith.constant 16 : i32
    %51 = arith.addi %50, %c16_i32_16 : i32
    %c16_i32_17 = arith.constant 16 : i32
    %52 = arith.cmpi sgt, %51, %c16_i32_17 : i32
    %53 = arith.extui %52 : i1 to i32
    %c0_i32_18 = arith.constant 0 : i32
    %54 = arith.cmpi ne, %53, %c0_i32_18 : i32
    scf.if %54 {
      %62 = tpu.iota {dimensions = array<i32: 0>} : vector<16x128xi32>
      %63 = vector.broadcast %50 : i32 to vector<16x128xi32>
      %64 = arith.addi %63, %62 : vector<16x128xi32>
      %c0_24 = arith.constant 0 : index
      %c0_25 = arith.constant 0 : index
      %65 = vector.load %arg5[%c0_24, %c0_25] : memref<16x128xf32, #tpu.memory_space<vmem>>, vector<16x128xf32>
      %c16_i32_26 = arith.constant 16 : i32
      %66 = vector.broadcast %c16_i32_26 : i32 to vector<16x128xi32>
      %67 = arith.cmpi slt, %64, %66 : vector<16x128xi32>
      %cst_27 = arith.constant 0.000000e+00 : f32
      %68 = vector.broadcast %cst_27 : f32 to vector<16x128xf32>
      %69 = arith.select %67, %47, %68 : vector<16x128xi1>, vector<16x128xf32>
      %70 = arith.addf %65, %69 : vector<16x128xf32>
      %c0_28 = arith.constant 0 : index
      %c0_29 = arith.constant 0 : index
      %71 = vector.load %arg5[%c0_28, %c0_29] : memref<16x128xf32, #tpu.memory_space<vmem>>, vector<16x128xf32>
      tpu.vector_store %arg5[%c0_28, %c0_29], %70 {strides = array<i32>} : memref<16x128xf32, #tpu.memory_space<vmem>>, vector<16x128xf32>,
    } else {
    }
    %c16_i32_19 = arith.constant 16 : i32
    %55 = arith.addi %50, %c16_i32_19 : i32
    %c16_i32_20 = arith.constant 16 : i32
    %56 = arith.cmpi sle, %55, %c16_i32_20 : i32
    %57 = arith.extui %56 : i1 to i32
    %c0_i32_21 = arith.constant 0 : i32
    %58 = arith.cmpi ne, %57, %c0_i32_21 : i32
    scf.if %58 {
      %c0_24 = arith.constant 0 : index
      %c0_25 = arith.constant 0 : index
      %62 = vector.load %arg5[%c0_24, %c0_25] : memref<16x128xf32, #tpu.memory_space<vmem>>, vector<16x128xf32>
      %63 = arith.addf %62, %47 : vector<16x128xf32>
      %c0_26 = arith.constant 0 : index
      %c0_27 = arith.constant 0 : index
      %64 = vector.load %arg5[%c0_26, %c0_27] : memref<16x128xf32, #tpu.memory_space<vmem>>, vector<16x128xf32>
      tpu.vector_store %arg5[%c0_26, %c0_27], %63 {strides = array<i32>} : memref<16x128xf32, #tpu.memory_space<vmem>>, vector<16x128xf32>,
    } else {
    }
    %c0_i32_22 = arith.constant 0 : i32
    %59 = arith.cmpi eq, %arg1, %c0_i32_22 : i32
    %60 = arith.extui %59 : i1 to i32
    %c0_i32_23 = arith.constant 0 : i32
    %61 = arith.cmpi ne, %60, %c0_i32_23 : i32
    scf.if %61 {
      %c0_24 = arith.constant 0 : index
      %c0_25 = arith.constant 0 : index
      %62 = vector.load %arg5[%c0_24, %c0_25] : memref<16x128xf32, #tpu.memory_space<vmem>>, vector<16x128xf32>
      %63 = vector.shape_cast %62 : vector<16x128xf32> to vector<1x16x128xf32>
      %cst_26 = arith.constant dense<0.000000e+00> : vector<1xf32>
      %64 = vector.multi_reduction <add>, %63, %cst_26 [1, 2] : vector<1x16x128xf32> to vector<1xf32>
      %65 = vector.shape_cast %64 : vector<1xf32> to vector<1x1x1xf32>
      %66 = vector.extract %65[0, 0, 0] : f32 from vector<1x1x1xf32>
      %67 = vector.broadcast %66 : f32 to vector<1x1xf32>
      %c0_27 = arith.constant 0 : index
      %c0_28 = arith.constant 0 : index
      %c0_29 = arith.constant 0 : index
      %68 = vector.load %arg4[%c0_27, %c0_28, %c0_29] : memref<1x1x1xf32, #tpu.memory_space<vmem>>, vector<1x1x1xf32>
      %69 = vector.shape_cast %68 : vector<1x1x1xf32> to vector<1x1xf32>
      %70 = vector.shape_cast %67 : vector<1x1xf32> to vector<1x1x1xf32>
      tpu.vector_store %arg4[%c0_27, %c0_28, %c0_29], %70 {strides = array<i32>} : memref<1x1x1xf32, #tpu.memory_space<vmem>>, vector<1x1x1xf32>,
    } else {
    }
    return
  }
  func.func @transform_0(%arg0: i32, %arg1: i32) -> (i32, i32) {
    %c1_i32 = arith.constant 1 : i32
    %0 = arith.muli %arg0, %c1_i32 : i32
    %1 = arith.addi %0, %arg1 : i32
    %c0_i32 = arith.constant 0 : i32
    %2 = arith.minsi %1, %c0_i32 : i32
    %c0_i32_0 = arith.constant 0 : i32
    %c0_i32_1 = arith.constant 0 : i32
    return %2, %c0_i32_0 : i32, i32
  }
  func.func @transform_1(%arg0: i32, %arg1: i32) -> (i32, i32) {
    %c1_i32 = arith.constant 1 : i32
    %0 = arith.muli %arg0, %c1_i32 : i32
    %1 = arith.addi %0, %arg1 : i32
    %c0_i32 = arith.constant 0 : i32
    %2 = arith.minsi %1, %c0_i32 : i32
    %c0_i32_0 = arith.constant 0 : i32
    %c0_i32_1 = arith.constant 0 : i32
    return %2, %c0_i32_0 : i32, i32
  }
  func.func @transform_2(%arg0: i32, %arg1: i32) -> (i32, i32, i32) {
    %c0_i32 = arith.constant 0 : i32
    %c0_i32_0 = arith.constant 0 : i32
    %c0_i32_1 = arith.constant 0 : i32
    return %arg0, %c0_i32, %c0_i32_0 : i32, i32, i32
  }
}

</mosaic_0001>

<bundles_post_ra>
// kernel: tpu_custom_call.1
= control target key start
LH: loop header
LB: loop body
LE: loop exit
PB: predicated region body
PF: predicated region fallthrough
CT: control target
= control target key end

     0   :  { %7 = vsyncpa [#allocation4], 0  ;;  %s835_s0 = inlined_call_operand.hbm [shape: f32[16,128], index: 0, kind: input, shape index: {}]   ;;  %s836_s1 = inlined_call_operand.hbm [shape: f32[16,128], index: 1, kind: input, shape index: {}]   ;;  %s837_s2 = inlined_call_operand.vmem [shape: f32[2,1,1], index: 2, kind: output, shape index: {}]  }
   0x1   :  { %9 = vsyncpa [#allocation4 + $0x1], 0 }
   0x2   :  { %10 = vsyncpa [#allocation6], 0 }
   0x3   :  { %12 = vsyncpa [#allocation6 + $0x1], 0  ;;  %s689_s9 = smov 0   ;;  %s691_s10 = smov 0  }
   0x4   :  { %s693_s11 = smov 0   ;;  %s695_s12 = smov 0  }
   0x5   :  { %s697_s13 = smov 0  }
   0x6 LB: > { %s463_s14 = sadd.s32 4294967295, %s667_s13   ;;  %s30_s15 = sadd.s32 1, %s663_s12  ;;  %s667_s13 = sphi %s697_s13, %s18_s13   ;;  %s663_s12 = sphi %s695_s12, %s850_s12   ;;  %s659_s11 = sphi %s693_s11, %s849_s11   ;;  %s655_s10 = sphi %s691_s10, %s825_s10   ;;  %s651_s9 = sphi %s689_s9, %s848_s9  }
   0x7   : > { %p32_p0 = scmp.ge.s32.totalorder %s30_s15, 2  ;;  %p648_p1 = scmp.ne.s32.totalorder %s655_s10, 0 }
   0x8   : > { %p51_p2 = scmp.eq.s32.totalorder %s667_s13, 0  ;;  %p56_p3 = scmp.ne.s32.totalorder %s655_s10, %s651_s9 }
   0x9   : > { %s852_s15 = smov (%p32_p0, %s30_s15), 0  ;;  %p57_p4 = scmp.eq.s32.totalorder %s463_s14, 0 }
   0xa   : > { %p52_p5 = por %p648_p1, %p51_p2  ;;  %p496_p7 = scmp.lt.s32.totalorder %s667_s13, 2 }
   0xb   : > { %p719_p6 = por %p57_p4, %p56_p3  ;;  %s669_s17 = smov [#allocation3]  }
   0xc   : > { %s152_s18 = sshll.u32 %s669_s17, 4  ;;  %p724_p8 = pnand %p496_p7, %p52_p5  ;;  %s153_s18 = int_to_ptr.vmem [resolvable:$true] %s152_s18 }
   0xd   : > { %s839_s16 = scalar_select %p719_p6, 1, 0 }
   0xe   : > { %s560_s22 = scalar_lea.hbm %s835_s0, 256  ;;  %p562_p10 = pneg %p724_p8 }
   0xf   : > { %p561_p9 = scmp.ne.s32.totalorder %s835_s0, %s560_s22  ;;  %p567_p13 = scmp.lt.s32.totalorder %s560_s22, %s560_s22 }
  0x11   : > { %p563_p11 = pnand %p562_p10, %p561_p9 }
  0x13   : > { %p564_p12 = pneg %p563_p11 }
  0x15   : > { %p569_p0 = pnand %p567_p13, %p564_p12 }
  0x17   : > { %572 = shalt.err (!%p569_p0)
}
  0x18   : > { %s573_s25 = scalar_lea.vmem %s153_s18, 256  ;;  %s580_s26 = scalar_lea.vmem %s153_s18, 512 }
  0x19   : > { %p574_p1 = scmp.ne.s32.totalorder %s153_s18, %s573_s25  ;;  %p581_p4 = scmp.lt.s32.totalorder %s153_s18, %s153_s18 }
  0x1a   : > { %p582_p5 = scmp.lt.s32.totalorder %s580_s26, %s573_s25 }
  0x1b   : > { %p576_p2 = pnand %p574_p1, %p562_p10 }
  0x1c   : > { %p583_p7 = por %p582_p5, %p581_p4 }
  0x1d   : > { %p577_p3 = pneg %p576_p2 }
  0x1f   : > { %p584_p6 = pnand %p583_p7, %p577_p3 }
  0x21   : > { %587 = shalt.err (!%p584_p6)
}
  0x22   : > { %s670_s27 = smov 128   ;;  %s671_s28 = smov 8  }
  0x23   : > { %492 = dma.hbm_to_vmem [thread:$0]  (!%p724_p8), %s835_s0, 256, %s153_s18, [#allocation4], %s670_s27, %s670_s27, %s671_s28  }
  0x24   : > { %p473_p9 = scmp.ge.s32.totalorder %s667_s13, 1  ;;  %p184_p11 = scmp.lt.s32.totalorder %s667_s13, 3 }
  0x25   : > { %s672_s4 = smov [#allocation5]   ;;  %s588_s8 = scalar_lea.hbm %s836_s1, 256 }
  0x26   : > { %p749_p12 = pnand %p473_p9, %p184_p11  ;;  %s176_s5 = sshll.u32 %s672_s4, 4  ;;  %s177_s5 = int_to_ptr.vmem [resolvable:$true] %s176_s5 }
  0x27   : > { %p589_p6 = scmp.ne.s32.totalorder %s836_s1, %s588_s8  ;;  %p595_p1 = scmp.lt.s32.totalorder %s588_s8, %s588_s8 }
  0x28   : > { %s841_s3 = scalar_select %p749_p12, 1, 0 }
  0x29   : > { %p591_p13 = pnand %p589_p6, %p562_p10 }
  0x2b   : > { %p592_p0 = pneg %p591_p13 }
  0x2d   : > { %p597_p2 = pnand %p595_p1, %p592_p0 }
  0x2f   : > { %600 = shalt.err (!%p597_p2)
}
  0x30   : > { %s601_s17 = scalar_lea.vmem %s177_s5, 256  ;;  %s608_s18 = scalar_lea.vmem %s177_s5, 512 }
  0x31   : > { %p602_p3 = scmp.ne.s32.totalorder %s177_s5, %s601_s17  ;;  %p609_p7 = scmp.lt.s32.totalorder %s177_s5, %s177_s5 }
  0x32   : > { %p610_p9 = scmp.lt.s32.totalorder %s608_s18, %s601_s17 }
  0x33   : > { %p604_p4 = pnand %p602_p3, %p562_p10 }
  0x34   : > { %p611_p11 = por %p610_p9, %p609_p7 }
  0x35   : > { %p605_p5 = pneg %p604_p4 }
  0x37   : > { %p612_p12 = pnand %p611_p11, %p605_p5 }
  0x39   : > { %615 = shalt.err (!%p612_p12)
}
  0x3a   : > { %495 = dma.hbm_to_vmem [thread:$0]  (!%p724_p8), %s836_s1, 256, %s177_s5, [#allocation6], %s670_s27, %s670_s27, %s671_s28  }
  0x3b   : > { %p842_p6 = scmp.ne.s32.totalorder %s841_s3, 0 }
  0x3c   : > { %s190_s22 = sand.u32 (!%p842_p6), 1, %s655_s10   ;;  %p843_p10 = scmp.ne.s32.totalorder (!%p842_p6), %s839_s16, 0 }
  0x3d   : > { %188 = sbr.rel (%p842_p6) target bundleno = 364 (0x16c), region = 28  ;;  %s474_s23 = sshll.u32 (!%p842_p6), %s190_s22, 4 }
  0x3e   : > { %s191_s24 = scalar_lea.sflag (!%p842_p6), [#allocation4], %s190_s22  ;;  %s194_s25 = scalar_lea.vmem (!%p842_p6), [#allocation3], %s474_s23 }
  0x42   : > { %641 = dma.done.wait (%p843_p10), %s191_s24, 256  }
  0x43   : > { %643 = vsyncadd (%p843_p10), %s191_s24, 4294967040  ;;  %s200_s19 = scalar_lea.sflag [#allocation6], %s190_s22  ;;  %s777_s26 = scalar_lea.vmem [#allocation5], %s474_s23 }
  0x44   : > { %645 = dma.done.wait (%p843_p10), %s200_s19, 256  }
  0x45   : > { %647 = vsyncadd (%p843_p10), %s200_s19, 4294967040  ;;  %p235_p8 = scmp.lt.s32.totalorder %s659_s11, 1  ;;  %s476_s27 = sshll.u32 %s659_s11, 4  ;;  %v673_v0 = vmov 0.0   ;;  %v244_v1 = vld [vmem:[%s194_s25] sm:$0xff]  ;;  %v245_v2 = vld [vmem:[%s194_s25 + $0x8] sm:$0xff] }
  0x46   : > { %242 = vst [vmem:[#allocation2] sm:$0xff] %v673_v0  ;;  %243 = vst [vmem:[#allocation2 + $0x8] sm:$0xff] %v673_v0  ;;  %s787_s28 = sadd.s32 16, %s476_s27  ;;  %v248_v3 = vand.u32 2147483647, %v244_v1  ;;  %v246_v22 = vld [vmem:[%s777_s26] sm:$0xff] }
  0x47   : > { %s790_s29 = scalar_select %p235_p8, %s659_s11, 1  ;;  %v249_v4 = vand.u32 2147483647, %v245_v2  ;;  %v247_v23 = vld [vmem:[%s777_s26 + $0x8] sm:$0xff]  ;;  %vm266_vm0 = vcmp.ge.f32.partialorder %v244_v1, 0.0  ;;  %vm267_vm1 = vcmp.ge.f32.partialorder %v245_v2, 0.0  ;;  %v274_v30 = vmul.f32 %v246_v22, %v244_v1 }
  0x48   : > { %v250_v5 = vsub.f32 0.0, %v248_v3  ;;  %v272_v29 = vmax.f32 %v244_v1, 0.0  ;;  %v273_v33 = vmax.f32 %v245_v2, 0.0  ;;  %v275_v34 = vmul.f32 %v247_v23, %v245_v2  ;;  %p477_p12 = scmp.le.s32.totalorder %s787_s28, 16 }
  0x49   : > { %s237_s16 = scalar_lea.vmem %s837_s2, %s790_s29  ;;  %v251_v6 = vsub.f32 0.0, %v249_v4  ;;  %v302_v38 = vsub.f32 1.0, %v246_v22  ;;  %v303_v39 = vsub.f32 1.0, %v247_v23  ;;  %v314_v58 = vmul.f32 0.25, %v246_v22 }
  0x4a   : > { %v252_v7 = vmul.f32 1.442695, %v250_v5  ;;  %v276_v51 = vsub.f32 %v272_v29, %v274_v30  ;;  %v277_v53 = vsub.f32 %v273_v33, %v275_v34  ;;  %v315_v61 = vmul.f32 0.25, %v247_v23 }
  0x4b   : > { %v254_v8 = vmul.f32 1.442695, %v251_v6  ;;  %v316_v59 = vmul.f32 0.75, %v302_v38  ;;  %v317_v62 = vmul.f32 0.75, %v303_v39 }
  0x4c   : > { %548 = vpow2.f32 %v252_v7 }
  0x4d   : > { %550 = vpow2.f32 %v254_v8  ;;  %v318_v4 = vadd.f32 %v316_v59, %v314_v58  ;;  %v319_v6 = vadd.f32 %v317_v62, %v315_v61 }
  0x59   : > { %v549_v9 = vpop.eup %548 }
  0x5a   : > { %v551_v10 = vpop.eup %550  ;;  %v256_v11 = vadd.f32 1.0, %v549_v9  ;;  %v281_v16 = vmul.f32 -0.5, %v549_v9  ;;  %v284_v21 = vand.u32 2147483647, %v549_v9 }
  0x5b   : > { %v257_v12 = vadd.f32 1.0, %v551_v10  ;;  %v290_v17 = vmul.f32 -0.5, %v551_v10  ;;  %v293_v35 = vand.u32 2147483647, %v551_v10 }
  0x5c   : > { %552 = vrcp.f32 %v256_v11  ;;  %v282_v25 = vadd.f32 1.0, %v281_v16  ;;  %vm798_vm2 = vcmp.lt.f32.partialorder %v284_v21, 0.0004427343 }
  0x5d   : > { %554 = vrcp.f32 %v257_v12  ;;  %v291_v26 = vadd.f32 1.0, %v290_v17  ;;  %vm804_vm3 = vcmp.lt.f32.partialorder %v293_v35, 0.0004427343 }
  0x5e   : > { %556 = vlog2.f32 %v256_v11  ;;  %v283_v42 = vmul.f32 %v549_v9, %v282_v25 }
  0x5f   : > { %558 = vlog2.f32 %v257_v12  ;;  %v292_v43 = vmul.f32 %v551_v10, %v291_v26 }
  0x69   : > { %v553_v13 = vpop.eup %552 }
  0x6a   : > { %v555_v14 = vpop.eup %554  ;;  %v260_v15 = vmul.f32 %v553_v13, %v256_v11 }
  0x6b   : > { %v261_v18 = vmul.f32 %v555_v14, %v257_v12  ;;  %v557_v27 = vpop.eup %556 }
  0x6c   : > { %v262_v19 = vsub.f32 2.0, %v260_v15  ;;  %v559_v31 = vpop.eup %558  ;;  %v280_v41 = vmul.f32 0.6931472, %v557_v27 }
  0x6d   : > { %v263_v20 = vsub.f32 2.0, %v261_v18  ;;  %v289_v45 = vmul.f32 0.6931472, %v559_v31 }
  0x6e   : > { %v264_v24 = vmul.f32 %v553_v13, %v262_v19  ;;  %v286_v54 = vsel %vm798_vm2, %v283_v42, %v280_v41 }
  0x6f   : > { %v265_v28 = vmul.f32 %v555_v14, %v263_v20  ;;  %v295_v56 = vsel %vm804_vm3, %v292_v43, %v289_v45  ;;  %v296_v63 = vadd.f32 %v286_v54, %v276_v51 }
  0x70   : > { %v268_v32 = vsub.f32 1.0, %v264_v24  ;;  %v297_v1 = vadd.f32 %v295_v56, %v277_v53 }
  0x71   : > { %v269_v36 = vsub.f32 1.0, %v265_v28 }
  0x72   : > { %v270_v40 = vsel %vm266_vm0, %v264_v24, %v268_v32 }
  0x73   : > { %v271_v44 = vsel %vm267_vm1, %v265_v28, %v269_v36  ;;  %v298_v46 = vmul.f32 %v270_v40, %v246_v22  ;;  %v300_v47 = vsub.f32 1.0, %v270_v40 }
  0x74   : > { %v299_v49 = vmul.f32 %v271_v44, %v247_v23  ;;  %v301_v50 = vsub.f32 1.0, %v271_v44 }
  0x75   : > { %v304_v52 = vmul.f32 %v302_v38, %v300_v47 }
  0x76   : > { %v305_v55 = vmul.f32 %v303_v39, %v301_v50 }
  0x77   : > { %v306_v57 = vadd.f32 %v304_v52, %v298_v46 }
  0x78   : > { %v307_v60 = vadd.f32 %v305_v55, %v299_v49 }
  0x79   : > { %v308_v0 = vsub.f32 1.0, %v306_v57 }
  0x7a   : > { %v309_v2 = vsub.f32 1.0, %v307_v60 }
  0x7b   : > { %v310_v3 = vmul.f32 %v308_v0, %v308_v0 }
  0x7c   : > { %v311_v5 = vmul.f32 %v309_v2, %v309_v2  ;;  %328 = sbr.rel (%p477_p12) target bundleno = 142 (0x8e), region = 44 }
  0x7d   : > { %v312_v7 = vmul.f32 %v310_v3, %v296_v63 }
  0x7e   : > { %v313_v8 = vmul.f32 %v311_v5, %v297_v1 }
  0x7f   : > { %v320_v9 = vmul.f32 %v318_v4, %v312_v7 }
  0x80   : > { %v321_v10 = vmul.f32 %v319_v6, %v313_v8 }
  0x81   : > { %v329_v11 = vlaneseq  ;;  %v332_v12 = vstv %s476_s27  ;;  %v335_v16 = vld [vmem:[#allocation2] sm:$0xff]  ;;  %v336_v19 = vld [vmem:[#allocation2 + $0x8] sm:$0xff] }
  0x83   : > { %v330_v13 = vshrl.u32 %v329_v11, 7 }
  0x85   : > { %v333_v14 = vadd.s32 %v332_v12, %v330_v13  ;;  %v331_v15 = vadd.s32 8, %v330_v13 }
  0x87   : > { %vm337_vm4 = vcmp.lt.s32.totalorder %v333_v14, 16  ;;  %v334_v17 = vadd.s32 %v332_v12, %v331_v15 }
  0x88   : > { %v339_v18 = vsel %vm337_vm4, %v320_v9, 0.0 }
  0x89   : > { %v341_v20 = vadd.f32 %v339_v18, %v335_v16  ;;  %vm338_vm5 = vcmp.lt.s32.totalorder %v334_v17, 16 }
  0x8a   : > { %v340_v21 = vsel %vm338_vm5, %v321_v10, 0.0 }
  0x8b   : > { %343 = vst [vmem:[#allocation2] sm:$0xff] %v341_v20  ;;  %v342_v22 = vadd.f32 %v340_v21, %v336_v19 }
  0x8d   : > { %344 = vst [vmem:[#allocation2 + $0x8] sm:$0xff] %v342_v22 }
  0x8e PF: > { %p478_p13 = scmp.gt.s32.totalorder %s787_s28, 16 }
  0x90   : > { %348 = sbr.rel (%p478_p13) target bundleno = 153 (0x99), region = 48 }
  0x95   : > { %v349_v23 = vld [vmem:[#allocation2] sm:$0xff]  ;;  %v350_v24 = vld [vmem:[#allocation2 + $0x8] sm:$0xff] }
  0x96   : > { %v351_v25 = vadd.f32 %v349_v23, %v320_v9  ;;  %v352_v26 = vadd.f32 %v350_v24, %v321_v10 }
  0x98   : > { %353 = vst [vmem:[#allocation2] sm:$0xff] %v351_v25  ;;  %354 = vst [vmem:[#allocation2 + $0x8] sm:$0xff] %v352_v26 }
  0x99 PF: > { %vm371_vm6 = vcmask 0  }
  0x9f   : > { %v358_v27 = vld [vmem:[#allocation2] sm:$0xff]  ;;  %v359_v28 = vld [vmem:[#allocation2 + $0x8] sm:$0xff] }
  0xa0   : > { %v360_v29 = vadd.f32 %v359_v28, %v358_v27 }
  0xa2   : > { %361 = vadd.xlane.f32.xlu0 %v360_v29 }
 0x12b   : > { %v362_v30 = vpop.xlane.xlu0 %361 }
 0x12c   : > { %v363_v31 = vrot.slane %v362_v30, 4 }
 0x12e   : > { %v364_v32 = vadd.f32 %v363_v31, %v362_v30 }
 0x130   : > { %v365_v33 = vrot.slane %v364_v32, 2 }
 0x132   : > { %v366_v34 = vadd.f32 %v365_v33, %v364_v32 }
 0x134   : > { %v367_v35 = vrot.slane %v366_v34, 1 }
 0x136   : > { %v368_v36 = vadd.f32 %v367_v35, %v366_v34 }
 0x138   : > { %483 = vpush %v368_v36 }
 0x169   : > { %s484_s11 = spop %483 }
 0x16a   : > { %v370_v37 = vstv %s484_s11 }
 0x16b   : > { %372 = vst.msk [vmem:[%s237_s16] sm:$0x1] %vm371_vm6, %v370_v37 }
 0x16c PF: > { %s18_s13 = sadd.s32 1, %s667_s13   ;;  %s848_s9 = smov %s655_s10 }
 0x16d   : > { %p15_p0 = scmp.ge.s32.totalorder %s18_s13, 4   ;;  %s825_s10 = smov 0  }
 0x16e   : > { %s849_s11 = smov %s663_s12  ;;  %s850_s12 = smov %s852_s15 }
 0x16f   :  { %17 = sbr.rel (!%p15_p0) target bundleno = 6 (0x6), region = 97 }
 0x174   :  { %390 = vsyncpa [#allocation4], 1 }
 0x175   :  { %392 = vsyncpa [#allocation4 + $0x1], 1 }
 0x176   :  { %393 = vsyncpa [#allocation6], 1 }
 0x177   :  { %395 = vsyncpa [#allocation6 + $0x1], 1 }

</bundles_post_ra>
